<compile_context>
chip_gen: v7x
topology: tpu7x:2x2x1
jax: 0.10.0
libtpu: 0.0.40
codegen_flags: <defaults>
</compile_context>

<pallas_src>
import math
import functools

import jax
import jax.numpy as jnp
from jax import lax
from jax.experimental import pallas as pl
from jax.experimental.pallas import tpu as pltpu


def _flash_xattn_kernel(q_ref, k_ref, v_ref, o_ref,
                        q_sc, m_sc, l_sc, acc_sc,
                        *, scale, block_k, sk_actual, mask_k, exp_dtype):
    """Online-softmax flash attention over the (innermost) kv grid axis.

    q_ref: (1, 1, bq, D)   resident across the kv axis
    k_ref: (1, 1, bk, D)   current kv tile
    v_ref: (1, 1, bk, D)
    o_ref: (1, 1, bq, D)   written on the last kv step
    scratch: q_sc (bq,D) q-dtype (pre-scaled q), m (bq,1) f32, l (bq,1) f32,
             acc (bq,D) f32
    """
    kv = pl.program_id(3)

    @pl.when(kv == 0)
    def _init():
        # Hoisted: fold the softmax scale into q ONCE per q tile (not once per kv step)
        # and keep it in the input dtype so the MXU sees a packed operand.
        q_sc[...] = (q_ref[0, 0] * scale).astype(q_sc.dtype)
        m_sc[...] = jnp.full_like(m_sc, -jnp.inf)
        l_sc[...] = jnp.zeros_like(l_sc)
        acc_sc[...] = jnp.zeros_like(acc_sc)

    q = q_sc[...]                         # (bq, D), already scaled
    k = k_ref[0, 0]                       # (bk, D)
    v = v_ref[0, 0]                       # (bk, D)

    # Scores (bq, bk) in f32: contract the D axes of both operands directly (NT form),
    # so no transposed copy of the K tile is materialized per kv step.
    s = lax.dot_general(
        q, k,
        dimension_numbers=(((1,), (1,)), ((), ())),
        preferred_element_type=jnp.float32,
    )

    if mask_k:
        # Zero-padded K columns (only in the last kv step) must not enter the softmax.
        col = kv * block_k + lax.broadcasted_iota(jnp.int32, (1, block_k), 1)
        s = jnp.where(col < sk_actual, s, -jnp.inf)

    m_prev = m_sc[...]                                    # (bq, 1)
    m_new = jnp.maximum(m_prev, s.max(axis=-1, keepdims=True))
    alpha = jnp.exp(m_prev - m_new)                       # rescale for previous stats

    x = s - m_new
    if exp_dtype is not None:
        # Optional EUP relief on v6e/v7x (bf16 exp path); do NOT enable on v5e.
        p = jnp.exp(x.astype(exp_dtype)).astype(jnp.float32)
    else:
        p = jnp.exp(x)                                    # (bq, bk) f32

    l_sc[...] = alpha * l_sc[...] + p.sum(axis=-1, keepdims=True)
    acc_sc[...] = alpha * acc_sc[...] + jnp.dot(
        p.astype(v.dtype), v, preferred_element_type=jnp.float32
    )
    m_sc[...] = m_new

    @pl.when(kv == pl.num_programs(3) - 1)
    def _finalize():
        inv_l = pl.reciprocal(l_sc[...], approx=True)
        o_ref[0, 0] = (acc_sc[...] * inv_l).astype(o_ref.dtype)


def _round_up(x, m):
    return ((x + m - 1) // m) * m


def flash_cross_attention(q, k, v, softmax_scale=None, block_q=None, block_k=None,
                          kv_buffer_count=2, exp_dtype=None, layout="bshd"):
    """q: (B, Sq, H, D); k, v: (B, Sk, H, D). Returns (B, Sq, H, D).

    Matches FlashCrossAttention.forward with causal=False, dropout_p=0.0 (eval).
    layout="bhsd" accepts/returns (B, H, S, D) and skips the wrapper HBM transposes.
    """
    assert q.dtype in (jnp.dtype('float16'), jnp.dtype('bfloat16'))
    assert k.dtype == q.dtype and v.dtype == q.dtype
    assert layout in ("bshd", "bhsd")

    if layout == "bshd":
        B, Sq, H, D = q.shape
        Bk, Sk, Hk, Dk = k.shape
    else:
        B, H, Sq, D = q.shape
        Bk, Hk, Sk, Dk = k.shape
    assert (Bk, Hk, Dk) == (B, H, D) and v.shape == k.shape
    scale = float(softmax_scale) if softmax_scale is not None else 1.0 / math.sqrt(D)

    # ---- tile selection (hardened): bq multiple of 16 (bf16 sublane tile), bk multiple
    # of 128 (lane tile).  Unaligned tails are handled by zero-padding + in-kernel mask.
    SUB, LANE = 16, 128
    if block_q is None:
        block_q = 1024 if Sq >= 2048 else 512          # KV re-streamed Sq/bq times
    if block_k is None:
        block_k = 1024 if Sk >= 1024 else 512          # amortize per-grid-step overhead
    bq = min(_round_up(max(block_q, SUB), SUB), _round_up(Sq, SUB))
    bk = min(_round_up(max(block_k, LANE), LANE), _round_up(Sk, LANE))
    sq_pad = _round_up(Sq, bq)
    sk_pad = _round_up(Sk, bk)
    mask_k = sk_pad != Sk

    # ---- layout plumbing: kernel wants contiguous (S, D) tiles per (batch, head).
    # TODO(synk): pass layout="bhsd" from the producer to skip these HBM passes entirely.
    if layout == "bshd":
        qt = jnp.transpose(q, (0, 2, 1, 3))
        kt = jnp.transpose(k, (0, 2, 1, 3))
        vt = jnp.transpose(v, (0, 2, 1, 3))
    else:
        qt, kt, vt = q, k, v
    if sq_pad != Sq:
        qt = jnp.pad(qt, ((0, 0), (0, 0), (0, sq_pad - Sq), (0, 0)))
    if sk_pad != Sk:
        kt = jnp.pad(kt, ((0, 0), (0, 0), (0, sk_pad - Sk), (0, 0)))
        vt = jnp.pad(vt, ((0, 0), (0, 0), (0, sk_pad - Sk), (0, 0)))

    # ---- VMEM budget: tiles (double-buffered) + scaled-q scratch + f32 stats/acc
    # + the (bq, bk) f32 score/prob intermediates (important once bq/bk grow on v7x).
    bytes_el = jnp.dtype(q.dtype).itemsize
    kv_bufs = max(2, kv_buffer_count or 2)
    est = (2 * 2 * (bq * D)                    # q-in + out tiles, double-buffered
           + 2 * kv_bufs * (bk * D)            # k + v tiles
           ) * bytes_el
    est += (bq * D) * bytes_el                 # pre-scaled q scratch
    est += (2 * bq * 128 + bq * D) * 4         # m, l (lane-padded) + acc (f32)
    est += 3 * bq * bk * 4                     # s, p, where/select intermediates (f32)
    vmem_limit = int(min(max(2 * est, 32 << 20), 48 << 20))   # <=48 MiB fits v7x's 64 MiB

    grid = (B, H, sq_pad // bq, sk_pad // bk)

    kv_spec_kwargs = {}
    if kv_buffer_count is not None and kv_buffer_count > 2:
        kv_spec_kwargs["pipeline_mode"] = pl.Buffered(kv_buffer_count)

    q_spec = pl.BlockSpec((1, 1, bq, D), lambda b, h, qi, ki: (b, h, qi, 0))
    k_spec = pl.BlockSpec((1, 1, bk, D), lambda b, h, qi, ki: (b, h, ki, 0),
                          **kv_spec_kwargs)
    v_spec = pl.BlockSpec((1, 1, bk, D), lambda b, h, qi, ki: (b, h, ki, 0),
                          **kv_spec_kwargs)
    o_spec = pl.BlockSpec((1, 1, bq, D), lambda b, h, qi, ki: (b, h, qi, 0))

    out = pl.pallas_call(
        functools.partial(_flash_xattn_kernel, scale=scale, block_k=bk,
                          sk_actual=Sk, mask_k=mask_k, exp_dtype=exp_dtype),
        out_shape=jax.ShapeDtypeStruct((B, H, sq_pad, D), q.dtype),
        grid_spec=pltpu.PrefetchScalarGridSpec(
            num_scalar_prefetch=0,
            grid=grid,
            in_specs=[q_spec, k_spec, v_spec],
            out_specs=o_spec,
            scratch_shapes=[
                pltpu.VMEM((bq, D), q.dtype),       # pre-scaled q (written at kv==0)
                pltpu.VMEM((bq, 1), jnp.float32),   # running max m
                pltpu.VMEM((bq, 1), jnp.float32),   # running denom l
                pltpu.VMEM((bq, D), jnp.float32),   # accumulator
            ],
        ),
        compiler_params=pltpu.CompilerParams(
            # B/H/q-tile axes parallel (megacore work even when B*H is small on v7x);
            # kv (reduction) stays innermost / arbitrary.
            dimension_semantics=("parallel", "parallel", "parallel", "arbitrary"),
            vmem_limit_bytes=vmem_limit,
        ),
    )(qt, kt, vt)

    if sq_pad != Sq:
        out = out[:, :, :Sq, :]
    if layout == "bshd":
        out = jnp.transpose(out, (0, 2, 1, 3))   # (B, H, Sq, D) -> (B, Sq, H, D)
    return out


def _reference_attention(q, k, v, scale):
    # plain-JAX reference for correctness check (f32 math)
    qf = q.astype(jnp.float32)
    kf = k.astype(jnp.float32)
    vf = v.astype(jnp.float32)
    s = jnp.einsum("bqhd,bkhd->bhqk", qf, kf) * scale
    p = jax.nn.softmax(s, axis=-1)
    o = jnp.einsum("bhqk,bkhd->bqhd", p, vf)
    return o.astype(q.dtype)


def _check(q, k, v, tol=5e-2, **kw):
    out = jax.block_until_ready(flash_cross_attention(q, k, v, **kw))
    ref = _reference_attention(q, k, v, 1.0 / math.sqrt(q.shape[-1]))
    err = float(jnp.max(jnp.abs(out.astype(jnp.float32) - ref.astype(jnp.float32))))
    assert out.shape == q.shape, (out.shape, q.shape)
    assert err < tol, f"max abs err {err}"
    return out


if __name__ == "__main__":
    key = jax.random.PRNGKey(0)
    keys = jax.random.split(key, 9)

    # 1) Small shapes consistent with the module: q,k,v are (B, S, H, D), bf16.
    #    Exercises the padded-q / masked-K tail path (Sq 8->16, Sk 16->128).
    B, Sq, Sk, H, D = 2, 8, 16, 4, 32
    q = jax.random.normal(keys[0], (B, Sq, H, D), dtype=jnp.bfloat16)
    k = jax.random.normal(keys[1], (B, Sk, H, D), dtype=jnp.bfloat16)
    v = jax.random.normal(keys[2], (B, Sk, H, D), dtype=jnp.bfloat16)
    _check(q, k, v)

    # 2) Aligned shapes with explicit small blocks: multiple q tiles AND kv steps.
    B2, Sq2, Sk2, H2, D2 = 1, 256, 512, 2, 128
    q2 = jax.random.normal(keys[3], (B2, Sq2, H2, D2), dtype=jnp.bfloat16)
    k2 = jax.random.normal(keys[4], (B2, Sk2, H2, D2), dtype=jnp.bfloat16)
    v2 = jax.random.normal(keys[5], (B2, Sk2, H2, D2), dtype=jnp.bfloat16)
    _check(q2, k2, v2, block_q=128, block_k=128)

    # 3) Default block selection (bq=512, bk=1024) at a modest aligned shape.
    B3, Sq3, Sk3, H3, D3 = 1, 512, 1024, 1, 128
    q3 = jax.random.normal(keys[6], (B3, Sq3, H3, D3), dtype=jnp.bfloat16)
    k3 = jax.random.normal(keys[7], (B3, Sk3, H3, D3), dtype=jnp.bfloat16)
    v3 = jax.random.normal(keys[8], (B3, Sk3, H3, D3), dtype=jnp.bfloat16)
    _check(q3, k3, v3)

    print("KERNEL_OK")
</pallas_src>

<mosaic_0001>
module attributes {stable_mosaic.version = 11 : i64} {
  func.func @_flash_xattn_kernel(%arg0: i32, %arg1: i32, %arg2: i32, %arg3: i32, %arg4: memref<1x1x16x32xbf16, #tpu.memory_space<vmem>>, %arg5: memref<1x1x128x32xbf16, #tpu.memory_space<vmem>>, %arg6: memref<1x1x128x32xbf16, #tpu.memory_space<vmem>>, %arg7: memref<1x1x16x32xbf16, #tpu.memory_space<vmem>>, %arg8: memref<16x32xbf16, #tpu.memory_space<vmem>>, %arg9: memref<16x1xf32, #tpu.memory_space<vmem>>, %arg10: memref<16x1xf32, #tpu.memory_space<vmem>>, %arg11: memref<16x32xf32, #tpu.memory_space<vmem>>) attributes {dimension_semantics = [#tpu.dimension_semantics<parallel>, #tpu.dimension_semantics<parallel>, #tpu.dimension_semantics<parallel>, #tpu.dimension_semantics<arbitrary>], iteration_bounds = array<i64: 2, 4, 1, 1>, scalar_prefetch = 0 : i64, scratch_operands = 4 : i64, tpu.core_type = #tpu.core_type<tc>, window_params = [{transform_indices = @transform_0, window_bounds = array<i64: 1, 1, 16, 32>}, {transform_indices = @transform_1, window_bounds = array<i64: 1, 1, 128, 32>}, {transform_indices = @transform_2, window_bounds = array<i64: 1, 1, 128, 32>}, {transform_indices = @transform_3, window_bounds = array<i64: 1, 1, 16, 32>}]} {
    %c0_i32 = arith.constant 0 : i32
    %0 = arith.cmpi eq, %arg3, %c0_i32 : i32
    %1 = arith.extui %0 : i1 to i32
    %c0_i32_0 = arith.constant 0 : i32
    %2 = arith.cmpi ne, %1, %c0_i32_0 : i32
    scf.if %2 {
      %c0_28 = arith.constant 0 : index
      %c0_29 = arith.constant 0 : index
      %c0_30 = arith.constant 0 : index
      %c0_31 = arith.constant 0 : index
      %45 = vector.load %arg4[%c0_28, %c0_29, %c0_30, %c0_31] : memref<1x1x16x32xbf16, #tpu.memory_space<vmem>>, vector<1x1x16x32xbf16>
      %46 = vector.shape_cast %45 : vector<1x1x16x32xbf16> to vector<16x32xbf16>
      %cst_32 = arith.constant 1.767580e-01 : bf16
      %47 = vector.broadcast %cst_32 : bf16 to vector<16x32xbf16>
      %48 = arith.mulf %46, %47 : vector<16x32xbf16>
      %c0_33 = arith.constant 0 : index
      %c0_34 = arith.constant 0 : index
      %49 = vector.load %arg8[%c0_33, %c0_34] : memref<16x32xbf16, #tpu.memory_space<vmem>>, vector<16x32xbf16>
      tpu.vector_store %arg8[%c0_33, %c0_34], %48 {strides = array<i32>} : memref<16x32xbf16, #tpu.memory_space<vmem>>, vector<16x32xbf16>,
      %cst_35 = arith.constant 0xFF800000 : f32
      %50 = vector.broadcast %cst_35 : f32 to vector<16x1xf32>
      %c0_36 = arith.constant 0 : index
      %c0_37 = arith.constant 0 : index
      %51 = vector.load %arg9[%c0_36, %c0_37] : memref<16x1xf32, #tpu.memory_space<vmem>>, vector<16x1xf32>
      tpu.vector_store %arg9[%c0_36, %c0_37], %50 {strides = array<i32>} : memref<16x1xf32, #tpu.memory_space<vmem>>, vector<16x1xf32>,
      %cst_38 = arith.constant 0.000000e+00 : f32
      %52 = vector.broadcast %cst_38 : f32 to vector<16x1xf32>
      %c0_39 = arith.constant 0 : index
      %c0_40 = arith.constant 0 : index
      %53 = vector.load %arg10[%c0_39, %c0_40] : memref<16x1xf32, #tpu.memory_space<vmem>>, vector<16x1xf32>
      tpu.vector_store %arg10[%c0_39, %c0_40], %52 {strides = array<i32>} : memref<16x1xf32, #tpu.memory_space<vmem>>, vector<16x1xf32>,
      %cst_41 = arith.constant 0.000000e+00 : f32
      %54 = vector.broadcast %cst_41 : f32 to vector<16x32xf32>
      %c0_42 = arith.constant 0 : index
      %c0_43 = arith.constant 0 : index
      %55 = vector.load %arg11[%c0_42, %c0_43] : memref<16x32xf32, #tpu.memory_space<vmem>>, vector<16x32xf32>
      tpu.vector_store %arg11[%c0_42, %c0_43], %54 {strides = array<i32>} : memref<16x32xf32, #tpu.memory_space<vmem>>, vector<16x32xf32>,
    } else {
    }
    %c0 = arith.constant 0 : index
    %c0_1 = arith.constant 0 : index
    %3 = vector.load %arg8[%c0, %c0_1] : memref<16x32xbf16, #tpu.memory_space<vmem>>, vector<16x32xbf16>
    %c0_2 = arith.constant 0 : index
    %c0_3 = arith.constant 0 : index
    %c0_4 = arith.constant 0 : index
    %c0_5 = arith.constant 0 : index
    %4 = vector.load %arg5[%c0_2, %c0_3, %c0_4, %c0_5] : memref<1x1x128x32xbf16, #tpu.memory_space<vmem>>, vector<1x1x128x32xbf16>
    %5 = vector.shape_cast %4 : vector<1x1x128x32xbf16> to vector<128x32xbf16>
    %c0_6 = arith.constant 0 : index
    %c0_7 = arith.constant 0 : index
    %c0_8 = arith.constant 0 : index
    %c0_9 = arith.constant 0 : index
    %6 = vector.load %arg6[%c0_6, %c0_7, %c0_8, %c0_9] : memref<1x1x128x32xbf16, #tpu.memory_space<vmem>>, vector<1x1x128x32xbf16>
    %7 = vector.shape_cast %6 : vector<1x1x128x32xbf16> to vector<128x32xbf16>
    %cst = arith.constant dense<0.000000e+00> : vector<16x128xf32>
    %8 = tpu.matmul %3, %5, %cst {dimension_numbers = #tpu.dot_dimension_numbers<[1], [1], [0], [0], [0, 0, 1, 0], [], []>} : vector<16x32xbf16>, vector<128x32xbf16>, vector<16x128xf32> -> vector<16x128xf32>
    %c128_i32 = arith.constant 128 : i32
    %9 = arith.muli %arg3, %c128_i32 : i32
    %10 = tpu.iota {dimensions = array<i32: 1>} : vector<1x128xi32>
    %11 = vector.broadcast %9 : i32 to vector<1x128xi32>
    %12 = arith.addi %11, %10 : vector<1x128xi32>
    %c16_i32 = arith.constant 16 : i32
    %13 = vector.broadcast %c16_i32 : i32 to vector<1x128xi32>
    %14 = arith.cmpi slt, %12, %13 : vector<1x128xi32>
    %cst_10 = arith.constant 0xFF800000 : f32
    %15 = vector.shape_cast %14 : vector<1x128xi1> to vector<1x128xi1>
    %16 = vector.broadcast %15 : vector<1x128xi1> to vector<16x128xi1>
    %17 = vector.broadcast %cst_10 : f32 to vector<16x128xf32>
    %18 = arith.select %16, %8, %17 : vector<16x128xi1>, vector<16x128xf32>
    %c0_11 = arith.constant 0 : index
    %c0_12 = arith.constant 0 : index
    %19 = vector.load %arg9[%c0_11, %c0_12] : memref<16x1xf32, #tpu.memory_space<vmem>>, vector<16x1xf32>
    %cst_13 = arith.constant dense<0xFF800000> : vector<16xf32>
    %20 = vector.multi_reduction <maximumf>, %18, %cst_13 [1] : vector<16x128xf32> to vector<16xf32>
    %21 = vector.shape_cast %20 : vector<16xf32> to vector<16x1xf32>
    %22 = arith.maximumf %19, %21 : vector<16x1xf32>
    %23 = arith.subf %19, %22 : vector<16x1xf32>
    %24 = math.exp %23 : vector<16x1xf32>
    %25 = vector.broadcast %22 : vector<16x1xf32> to vector<16x128xf32>
    %26 = arith.subf %18, %25 : vector<16x128xf32>
    %27 = math.exp %26 : vector<16x128xf32>
    %c0_14 = arith.constant 0 : index
    %c0_15 = arith.constant 0 : index
    %28 = vector.load %arg10[%c0_14, %c0_15] : memref<16x1xf32, #tpu.memory_space<vmem>>, vector<16x1xf32>
    %29 = arith.mulf %24, %28 : vector<16x1xf32>
    %cst_16 = arith.constant dense<0.000000e+00> : vector<16xf32>
    %30 = vector.multi_reduction <add>, %27, %cst_16 [1] : vector<16x128xf32> to vector<16xf32>
    %31 = vector.shape_cast %30 : vector<16xf32> to vector<16x1xf32>
    %32 = arith.addf %29, %31 : vector<16x1xf32>
    %c0_17 = arith.constant 0 : index
    %c0_18 = arith.constant 0 : index
    %33 = vector.load %arg10[%c0_17, %c0_18] : memref<16x1xf32, #tpu.memory_space<vmem>>, vector<16x1xf32>
    tpu.vector_store %arg10[%c0_17, %c0_18], %32 {strides = array<i32>} : memref<16x1xf32, #tpu.memory_space<vmem>>, vector<16x1xf32>,
    %c0_19 = arith.constant 0 : index
    %c0_20 = arith.constant 0 : index
    %34 = vector.load %arg11[%c0_19, %c0_20] : memref<16x32xf32, #tpu.memory_space<vmem>>, vector<16x32xf32>
    %35 = vector.broadcast %24 : vector<16x1xf32> to vector<16x32xf32>
    %36 = arith.mulf %35, %34 : vector<16x32xf32>
    %37 = arith.truncf %27 : vector<16x128xf32> to vector<16x128xbf16>
    %cst_21 = arith.constant dense<0.000000e+00> : vector<16x32xf32>
    %38 = tpu.matmul %37, %7, %cst_21 {dimension_numbers = #tpu.dot_dimension_numbers<[1], [0], [0], [1], [0, 0, 1, 1], [], []>} : vector<16x128xbf16>, vector<128x32xbf16>, vector<16x32xf32> -> vector<16x32xf32>
    %39 = arith.addf %36, %38 : vector<16x32xf32>
    %c0_22 = arith.constant 0 : index
    %c0_23 = arith.constant 0 : index
    %40 = vector.load %arg11[%c0_22, %c0_23] : memref<16x32xf32, #tpu.memory_space<vmem>>, vector<16x32xf32>
    tpu.vector_store %arg11[%c0_22, %c0_23], %39 {strides = array<i32>} : memref<16x32xf32, #tpu.memory_space<vmem>>, vector<16x32xf32>,
    %c0_24 = arith.constant 0 : index
    %c0_25 = arith.constant 0 : index
    %41 = vector.load %arg9[%c0_24, %c0_25] : memref<16x1xf32, #tpu.memory_space<vmem>>, vector<16x1xf32>
    tpu.vector_store %arg9[%c0_24, %c0_25], %22 {strides = array<i32>} : memref<16x1xf32, #tpu.memory_space<vmem>>, vector<16x1xf32>,
    %c0_i32_26 = arith.constant 0 : i32
    %42 = arith.cmpi eq, %arg3, %c0_i32_26 : i32
    %43 = arith.extui %42 : i1 to i32
    %c0_i32_27 = arith.constant 0 : i32
    %44 = arith.cmpi ne, %43, %c0_i32_27 : i32
    scf.if %44 {
      %c0_28 = arith.constant 0 : index
      %c0_29 = arith.constant 0 : index
      %45 = vector.load %arg10[%c0_28, %c0_29] : memref<16x1xf32, #tpu.memory_space<vmem>>, vector<16x1xf32>
      %46 = tpu.reciprocal %45 {approx = true} : vector<16x1xf32> -> vector<16x1xf32>
      %c0_30 = arith.constant 0 : index
      %c0_31 = arith.constant 0 : index
      %47 = vector.load %arg11[%c0_30, %c0_31] : memref<16x32xf32, #tpu.memory_space<vmem>>, vector<16x32xf32>
      %48 = vector.broadcast %46 : vector<16x1xf32> to vector<16x32xf32>
      %49 = arith.mulf %47, %48 : vector<16x32xf32>
      %50 = arith.truncf %49 : vector<16x32xf32> to vector<16x32xbf16>
      %c0_32 = arith.constant 0 : index
      %c0_33 = arith.constant 0 : index
      %c0_34 = arith.constant 0 : index
      %c0_35 = arith.constant 0 : index
      %51 = vector.load %arg7[%c0_32, %c0_33, %c0_34, %c0_35] : memref<1x1x16x32xbf16, #tpu.memory_space<vmem>>, vector<1x1x16x32xbf16>
      %52 = vector.shape_cast %51 : vector<1x1x16x32xbf16> to vector<16x32xbf16>
      %53 = vector.shape_cast %50 : vector<16x32xbf16> to vector<1x1x16x32xbf16>
      tpu.vector_store %arg7[%c0_32, %c0_33, %c0_34, %c0_35], %53 {strides = array<i32>} : memref<1x1x16x32xbf16, #tpu.memory_space<vmem>>, vector<1x1x16x32xbf16>,
    } else {
    }
    return
  }
  func.func @transform_0(%arg0: i32, %arg1: i32, %arg2: i32, %arg3: i32) -> (i32, i32, i32, i32) {
    %c0_i32 = arith.constant 0 : i32
    %c0_i32_0 = arith.constant 0 : i32
    return %arg0, %arg1, %arg2, %c0_i32 : i32, i32, i32, i32
  }
  func.func @transform_1(%arg0: i32, %arg1: i32, %arg2: i32, %arg3: i32) -> (i32, i32, i32, i32) {
    %c0_i32 = arith.constant 0 : i32
    %c0_i32_0 = arith.constant 0 : i32
    return %arg0, %arg1, %arg3, %c0_i32 : i32, i32, i32, i32
  }
  func.func @transform_2(%arg0: i32, %arg1: i32, %arg2: i32, %arg3: i32) -> (i32, i32, i32, i32) {
    %c0_i32 = arith.constant 0 : i32
    %c0_i32_0 = arith.constant 0 : i32
    return %arg0, %arg1, %arg3, %c0_i32 : i32, i32, i32, i32
  }
  func.func @transform_3(%arg0: i32, %arg1: i32, %arg2: i32, %arg3: i32) -> (i32, i32, i32, i32) {
    %c0_i32 = arith.constant 0 : i32
    %c0_i32_0 = arith.constant 0 : i32
    return %arg0, %arg1, %arg2, %c0_i32 : i32, i32, i32, i32
  }
}

</mosaic_0001>

<bundles_post_ra>
// kernel: tpu_custom_call.1
= control target key start
LH: loop header
LB: loop body
LE: loop exit
PB: predicated region body
PF: predicated region fallthrough
CT: control target
= control target key end

     0   :  { %8 = vsyncpa [#allocation7], 0  ;;  %s1402_s0 = inlined_call_operand.vmem [shape: bf16[2,4,16,32], index: 0, kind: input, shape index: {}]   ;;  %s1403_s1 = inlined_call_operand.vmem [shape: bf16[2,4,128,32], index: 1, kind: input, shape index: {}]   ;;  %s1404_s2 = inlined_call_operand.vmem [shape: bf16[2,4,128,32], index: 2, kind: input, shape index: {}]   ;;  %s1405_s3 = inlined_call_operand.hbm [shape: bf16[2,4,16,32], index: 3, kind: output, shape index: {}]  }
   0x1   :  { %10 = vsyncpa [#allocation7 + $0x1], 0  ;;  %s1185_s12 = smov 0   ;;  %s1187_s13 = smov 0  }
   0x2   :  { %s1189_s14 = smov 0   ;;  %s1191_s15 = smov 0  }
   0x3   :  { %s1193_s16 = smov 0   ;;  %s1195_s17 = smov 0  }
   0x4   :  { %s1197_s18 = smov 0   ;;  %s1199_s19 = smov 0  }
   0x5 LB: > { %s854_s20 = sadd.s32 4294967295, %s1156_s19   ;;  %s855_s21 = sadd.s32 4294967294, %s1156_s19   ;;  %s1156_s19 = sphi %s1199_s19, %s16_s19   ;;  %s1152_s18 = sphi %s1197_s18, %s1414_s18   ;;  %s1148_s17 = sphi %s1195_s17, %s1413_s17   ;;  %s1144_s16 = sphi %s1193_s16, %s1412_s16   ;;  %s1140_s15 = sphi %s1191_s15, %s1411_s15   ;;  %s1136_s14 = sphi %s1189_s14, %s1410_s14   ;;  %s1132_s13 = sphi %s1187_s13, %s1409_s13   ;;  %s1128_s12 = sphi %s1185_s12, %s1408_s12  }
   0x6   : > { %s38_s22 = sadd.s32 1, %s1148_s17  ;;  %s42_s23 = sadd.s32 1, %s1152_s18 }
   0x7   : > { %p40_p0 = scmp.ge.s32.totalorder %s38_s22, 4  ;;  %p153_p1 = scmp.ne.s32.totalorder %s1136_s14, %s1132_s13 }
   0x8   : > { %p154_p2 = scmp.eq.s32.totalorder %s854_s20, 7  ;;  %p159_p5 = scmp.ne.s32.totalorder %s1132_s13, %s1128_s12 }
   0x9   : > { %s1416_s22 = smov (%p40_p0, %s38_s22), 0  ;;  %s1418_s23 = smov (!%p40_p0, %s42_s23), %s1152_s18 }
   0xa   : > { %s137_s24 = ssub.s32 %s1148_s17, %s1416_s22  ;;  %p1236_p3 = por %p154_p2, %p153_p1 }
   0xb   : > { %p44_p4 = scmp.ge.s32.totalorder %s1418_s23, 2  ;;  %p160_p6 = scmp.eq.s32.totalorder %s855_s21, 7 }
   0xc   : > { %p858_p7 = scmp.ge.s32.totalorder %s1156_s19, 1  ;;  %p229_p9 = scmp.lt.s32.totalorder %s1156_s19, 9 }
   0xd   : > { %s1420_s23 = smov (%p44_p4, %s1418_s23), 0  ;;  %p1245_p8 = por %p160_p6, %p159_p5 }
   0xe   : > { %s136_s27 = ssub.s32 %s1152_s18, %s1420_s23  ;;  %s143_s28 = sadd.s32 1, %s1136_s14 }
   0xf   : > { %s138_s29 = sor.u32 %s137_s24, %s136_s27  ;;  %p230_p10 = pnand %p858_p7, %p229_p9 }
  0x10   : > { %p141_p11 = scmp.eq.s32.totalorder %s138_s29, 0  ;;  %p288_p12 = scmp.lt.s32.totalorder (!%p230_p10), %s1144_s16, 1  ;;  %vm346_vm0 = vcmask (!%p230_p10), 261120   ;;  %v1158_v0 = vmov (!%p230_p10), 0.0   ;;  %vm1159_vm1 = vmmov (!%p230_p10), 0   ;;  %vm348_vm2 = vcmask (!%p230_p10), 7168  }
  0x11   : > { %233 = sbr.rel (%p230_p10) target bundleno = 910 (0x38e), region = 32  ;;  %p290_p13 = scmp.lt.s32.totalorder (!%p230_p10), %s1140_s15, 3  ;;  %915 = vmatprep.subr.bf16.mxu0 (!%p230_p10), %v1158_v0  ;;  %353 = vst.msk [vmem:[#allocation5] sm:$0xff] (!%p230_p10), %vm346_vm0, %v1158_v0  ;;  %354 = vst.msk [vmem:[#allocation5 + $0x8] sm:$0xff] (!%p230_p10), %vm346_vm0, %v1158_v0  ;;  %931 = vmatprep.mubr.msk.bf16.mxu0 (!%p230_p10), %vm1159_vm1, %v1158_v0  ;;  %v1160_v23 = vmov (!%p230_p10), -inf   ;;  %v498_v24 = vlaneseq (!%p230_p10)  ;;  %v1161_v32 = vmov (!%p230_p10), 0  }
  0x12   : > { %s1254_s30 = scalar_select %p141_p11, %s1136_s14, %s143_s28  }
  0x13   : > { %935 = vmatprep.subr.bf16.mxu1 (!%p230_p10), %v1158_v0  ;;  %951 = vmatprep.mubr.msk.bf16.mxu1 (!%p230_p10), %vm1159_vm1, %v1158_v0  ;;  %349 = vst.msk [vmem:[#allocation3] sm:$0xff] (!%p230_p10), %vm348_vm2, %v1160_v23  ;;  %350 = vst.msk [vmem:[#allocation3 + $0x8] sm:$0xff] (!%p230_p10), %vm348_vm2, %v1160_v23  ;;  %v499_v25 = vand.u32 (!%p230_p10), 127, %v498_v24  ;;  %vm689_vm4 = vcmask (!%p230_p10), 257024  }
  0x14   : > { %351 = vst.msk [vmem:[#allocation4] sm:$0xff] (!%p230_p10), %vm348_vm2, %v1158_v0  ;;  %352 = vst.msk [vmem:[#allocation4 + $0x8] sm:$0xff] (!%p230_p10), %vm348_vm2, %v1158_v0  ;;  %1032 = vset.pattern.permute.xlu1 (!%p230_p10), %v1161_v32  ;;  %1033 = vset.pattern.permute.xlu0 (!%p230_p10), %v1161_v32 }
  0x15   : > { %vm502_vm3 = vcmp.lt.s32.totalorder (!%p230_p10), %v499_v25, 16 }
  0x18   : > { %s289_s4 = scalar_select %p288_p12, %s1144_s16, 1 }
  0x19   : > { %s291_s5 = scalar_select %p290_p13, %s1140_s15, 3 }
  0x1a   : > { %s864_s6 = sshll.u32 %s289_s4, 6  ;;  %s861_s7 = sshll.u32 %s289_s4, 3  ;;  %v507_v36 = vld [vmem:[#allocation3] sm:$0xff]  ;;  %v508_v39 = vld [vmem:[#allocation3 + $0x8] sm:$0xff] }
  0x1b   : > { %s863_s8 = sshll.u32 %s291_s5, 4  ;;  %s860_s9 = sshll.u32 %s291_s5, 1  ;;  %v537_v62 = vld [vmem:[#allocation4] sm:$0xff] }
  0x1c   : > { %s1268_s10 = sadd.s32 %s864_s6, %s863_s8  ;;  %s297_s27 = sadd.s32 %s861_s7, %s860_s9 }
  0x1d   : > { %s865_s11 = sshll.u32 %s1268_s10, 2  ;;  %s862_s28 = sshll.u32 %s297_s27, 2 }
  0x1e   : > { %s1276_s24 = scalar_lea.vmem %s1403_s1, %s865_s11  ;;  %s299_s5 = scalar_lea.vmem %s1402_s0, %s862_s28 }
  0x1f   : > { %v1034_v1 = vld [vmem:[%s1276_s24] sm:$0xff]   ;;  %v1035_v3 = vld [vmem:[%s1276_s24 + $0x8] sm:$0xff]   ;;  %v1036_v10 = vld [vmem:[%s1276_s24 + $0x10] sm:$0xff]   ;;  %s1317_s8 = scalar_lea.vmem %s1404_s2, %s865_s11  ;;  %s284_s9 = sand.u32 1, %s1132_s13  }
  0x20   : > { %v433_v2 = vsel %vm346_vm0, %v1034_v1, 0  ;;  %v436_v4 = vsel %vm346_vm0, %v1035_v3, 0  ;;  %v336_v5 = vld [vmem:[%s299_s5] sm:$0xf]  ;;  %v337_v6 = vld [vmem:[%s299_s5 + $0x4] sm:$0xf] }
  0x21   : > { %916 = vmatpush3.bf16.xpose.msra.mxu0 %v433_v2  ;;  %v338_v7 = vmul.bf16 1043676725, %v336_v5  ;;  %v339_v8 = vmul.bf16 1043676725, %v337_v6  ;;  %v439_v11 = vsel %vm346_vm0, %v1036_v10, 0  ;;  %v1037_v12 = vld [vmem:[%s1276_s24 + $0x18] sm:$0xff]  }
  0x22   : > { %917 = vmatprep.subr.bf16.mxu0 %v1158_v0  ;;  %v442_v13 = vsel %vm346_vm0, %v1037_v12, 0  ;;  %v1038_v14 = vld [vmem:[%s1276_s24 + $0x20] sm:$0xff]   ;;  %v1039_v16 = vld [vmem:[%s1276_s24 + $0x28] sm:$0xff]   ;;  %v1040_v18 = vld [vmem:[%s1276_s24 + $0x30] sm:$0xff]   ;;  %s890_s10 = sshll.u32 %s1140_s15, 1  ;;  %s891_s11 = sshll.u32 %s1144_s16, 3 }
  0x23   : > { %v869_v9 = vcombine.low %v338_v7, %v339_v8  ;;  %v445_v15 = vsel %vm346_vm0, %v1038_v14, 0  ;;  %v448_v17 = vsel %vm346_vm0, %v1039_v16, 0  ;;  %v451_v19 = vsel %vm346_vm0, %v1040_v18, 0  ;;  %v1041_v20 = vld [vmem:[%s1276_s24 + $0x38] sm:$0xff]   ;;  %v1042_v33 = vld [vmem:[%s1317_s8] sm:$0xff]   ;;  %v1043_v34 = vld [vmem:[%s1317_s8 + $0x8] sm:$0xff]   ;;  %s707_s21 = sadd.s32 %s891_s11, %s890_s10 }
  0x24   : > { %v454_v21 = vsel %vm346_vm0, %v1041_v20, 0  ;;  %936 = vmatpush3.bf16.msra.mxu1 %v1042_v33  ;;  %v1044_v35 = vld [vmem:[%s1317_s8 + $0x10] sm:$0xff]   ;;  %v1045_v41 = vld [vmem:[%s1317_s8 + $0x18] sm:$0xff]   ;;  %v1046_v45 = vld [vmem:[%s1317_s8 + $0x20] sm:$0xff]   ;;  %s859_s20 = sshll.u32 %s284_s9, 3  ;;  %s892_s28 = sshll.u32 %s707_s21, 6 }
  0x25   : > { %347 = vst.msk [vmem:[#allocation2] sm:$0xff] %vm346_vm0, %v869_v9  ;;  %937 = vmatprep.subr.bf16.mxu1 %v1158_v0  ;;  %v1047_v46 = vld [vmem:[%s1317_s8 + $0x28] sm:$0xff]   ;;  %v1048_v47 = vld [vmem:[%s1317_s8 + $0x30] sm:$0xff]   ;;  %v1049_v48 = vld [vmem:[%s1317_s8 + $0x38] sm:$0xff]   ;;  %s286_s24 = scalar_lea.vmem [#allocation6], %s859_s20  ;;  %s1348_s29 = scalar_lea.hbm %s1405_s3, %s892_s28 }
  0x26   : > { %v538_v1 = vld [vmem:[#allocation4 + $0x8] sm:$0xff]  ;;  %v550_v10 = vld [vmem:[#allocation5] sm:$0xff]  ;;  %v551_v12 = vld [vmem:[#allocation5 + $0x8] sm:$0xff]  ;;  %s710_s27 = sshll.u32 %s286_s24, 4  ;;  %s1350_s4 = scalar_lea.sflag [#allocation7], %s284_s9  ;;  %s1343_s27 = int_to_ptr.vmem [resolvable:$true] %s710_s27 }
  0x27   : > { %s1062_s5 = scalar_lea.vmem %s1343_s27, 128  ;;  %s1162_s6 = smov [#allocation6]  }
  0x28   : > { %938 = vmatpush3.bf16.msra.mxu1 %v1043_v34  ;;  %p1063_p0 = scmp.ne.s32.totalorder %s1343_s27, %s1062_s5  ;;  %s1066_s7 = sshll.u32 %s1162_s6, 4  ;;  %s1067_s7 = int_to_ptr.vmem [resolvable:$false] %s1066_s7 }
  0x29   : > { %918 = vmatpush3.bf16.xpose.msra.mxu0 %v436_v4  ;;  %939 = vmatprep.subr.bf16.mxu1 %v1158_v0  ;;  %s1068_s8 = scalar_lea.vmem %s1067_s7, 256  ;;  %p1069_p4 = scmp.lt.s32.totalorder %s1343_s27, %s1067_s7 }
  0x2a   : > { %919 = vmatprep.subr.bf16.mxu0 %v1158_v0  ;;  %p1064_p1 = pnand %p1063_p0, %p1236_p3  ;;  %p1070_p5 = scmp.lt.s32.totalorder %s1068_s8, %s1062_s5 }
  0x2c   : > { %v355_v22 = vld [vmem:[#allocation2] sm:$0xff]  ;;  %940 = vmatpush3.bf16.msra.mxu1 %v1044_v35  ;;  %p1065_p2 = pneg %p1064_p1  ;;  %p1071_p6 = por %p1070_p5, %p1069_p4 }
  0x2d   : > { %941 = vmatprep.subr.bf16.mxu1 %v1158_v0 }
  0x2e   : > { %p1072_p7 = pnand %p1071_p6, %p1065_p2 }
  0x30   : > { %942 = vmatpush3.bf16.msra.mxu1 %v1045_v41 }
  0x31   : > { %920 = vmatpush3.bf16.xpose.msra.mxu0 %v439_v11  ;;  %943 = vmatprep.subr.bf16.mxu1 %v1158_v0 }
  0x32   : > { %921 = vmatprep.subr.bf16.mxu0 %v1158_v0 }
  0x34   : > { %944 = vmatpush3.bf16.msra.mxu1 %v1046_v45 }
  0x35   : > { %945 = vmatprep.subr.bf16.mxu1 %v1158_v0 }
  0x38   : > { %946 = vmatpush3.bf16.msra.mxu1 %v1047_v46 }
  0x39   : > { %922 = vmatpush3.bf16.xpose.msra.mxu0 %v442_v13  ;;  %947 = vmatprep.subr.bf16.mxu1 %v1158_v0 }
  0x3a   : > { %923 = vmatprep.subr.bf16.mxu0 %v1158_v0 }
  0x3c   : > { %948 = vmatpush3.bf16.msra.mxu1 %v1048_v47 }
  0x3d   : > { %949 = vmatprep.subr.bf16.mxu1 %v1158_v0 }
  0x40   : > { %950 = vmatpush3.bf16.msra.mxu1 %v1049_v48 }
  0x41   : > { %924 = vmatpush3.bf16.xpose.msra.mxu0 %v445_v15 }
  0x42   : > { %925 = vmatprep.subr.bf16.mxu0 %v1158_v0 }
  0x49   : > { %926 = vmatpush3.bf16.xpose.msra.mxu0 %v448_v17 }
  0x4a   : > { %927 = vmatprep.subr.bf16.mxu0 %v1158_v0 }
  0x51   : > { %928 = vmatpush3.bf16.xpose.msra.mxu0 %v451_v19 }
  0x52   : > { %929 = vmatprep.subr.bf16.mxu0 %v1158_v0 }
  0x59   : > { %930 = vmatpush3.bf16.xpose.msra.mxu0 %v454_v21 }
  0x60   : > { %932 = vmatmul.mubr.msk.bf16.vlgmr.msra.gmra.mrb[0].mxu0 %vm346_vm0, %v355_v22 }
 0x133   : > { %v490_v26 = vpop.f32.mrb[0].mxu0 }
 0x134   : > { %v933_v27 = vpop.f32.mrb[1].mxu0  ;;  %v505_v28 = vsel %vm502_vm3, %v490_v26, -inf }
 0x135   : > { %509 = vmax.xlane.f32.xlu0 %v505_v28  ;;  %v493_v29 = vpop.f32.mrb[2].mxu0 }
 0x136   : > { %v934_v30 = vpop.f32.mrb[3].mxu0  ;;  %v506_v31 = vsel %vm502_vm3, %v493_v29, -inf }
 0x139   : > { %511 = vmax.xlane.f32.xlu0 %v506_v31 }
 0x1c2   : > { %v510_v37 = vpop.xlane.xlu0 %509 }
 0x1c3   : > { %v513_v38 = vmax.f32 %v507_v36, %v510_v37 }
 0x1c5   : > { %v515_v40 = vsub.f32 %v507_v36, %v513_v38  ;;  %658 = vst.msk [vmem:[#allocation3] sm:$0xff] %vm348_vm2, %v513_v38  ;;  %523 = vperm.xlu1 %1032, %v513_v38  }
 0x1c6   : > { %v512_v42 = vpop.xlane.xlu0 %511 }
 0x1c7   : > { %v514_v43 = vmax.f32 %v508_v39, %v512_v42  ;;  %v517_v59 = vmul.f32 1.442695, %v515_v40 }
 0x1c9   : > { %v516_v44 = vsub.f32 %v508_v39, %v514_v43  ;;  %659 = vst.msk [vmem:[#allocation3 + $0x8] sm:$0xff] %vm348_vm2, %v514_v43  ;;  %528 = vperm.xlu1 %1032, %v514_v43  }
 0x1cb   : > { %v519_v58 = vmul.f32 1.442695, %v516_v44 }
 0x244   : > { %v524_v49 = vpop.permute.xlu1 %523 }
 0x245   : > { %v531_v50 = vsub.f32 %v505_v28, %v524_v49 }
 0x247   : > { %v533_v51 = vmul.f32 1.442695, %v531_v50 }
 0x248   : > { %v529_v52 = vpop.permute.xlu1 %528 }
 0x249   : > { %1050 = vpow2.f32 %v533_v51  ;;  %v532_v53 = vsub.f32 %v506_v31, %v529_v52 }
 0x24b   : > { %v535_v54 = vmul.f32 1.442695, %v532_v53 }
 0x24d   : > { %1052 = vpow2.f32 %v535_v54 }
 0x24e   : > { %1054 = vpow2.f32 %v519_v58 }
 0x24f   : > { %1056 = vpow2.f32 %v517_v59 }
 0x253   : > { %v1051_v55 = vpop.eup %1050 }
 0x254   : > { %541 = vadd.xlane.f32.xlu0 %v1051_v55 }
 0x257   : > { %v1053_v56 = vpop.eup %1052 }
 0x258   : > { %543 = vadd.xlane.f32.xlu1 %v1053_v56  ;;  %v564_v57 = vpack.c.bf16 %v1053_v56, %v1051_v55  ;;  %v1055_v60 = vpop.eup %1054 }
 0x259   : > { %v1057_v61 = vpop.eup %1056  ;;  %v540_v3 = vmul.f32 %v1055_v60, %v538_v1 }
 0x25a   : > { %952 = vmatmul.mubr.bf16.vlgmr.msra.gmra.mrb[0].mxu1 %v564_v57  ;;  %v539_v63 = vmul.f32 %v1057_v61, %v537_v62 }
 0x269   : > { %559 = vperm.xlu1 %1032, %v1055_v60  }
 0x26a   : > { %554 = vperm.xlu0 %1033, %v1057_v61  }
 0x2e1   : > { %v542_v0 = vpop.xlane.xlu0 %541 }
 0x2e2   : > { %v545_v2 = vadd.f32 %v542_v0, %v539_v63 }
 0x2e4   : > { %548 = vst.msk [vmem:[#allocation4] sm:$0xff] %vm348_vm2, %v545_v2 }
 0x2e5   : > { %v544_v4 = vpop.xlane.xlu1 %543 }
 0x2e6   : > { %v546_v5 = vadd.f32 %v544_v4, %v540_v3 }
 0x2e8   : > { %549 = vst.msk [vmem:[#allocation4 + $0x8] sm:$0xff] %vm348_vm2, %v546_v5 }
 0x2e9   : > { %v555_v11 = vpop.permute.xlu0 %554  ;;  %v560_v13 = vpop.permute.xlu1 %559 }
 0x2ea   : > { %v562_v14 = vmul.f32 %v555_v11, %v550_v10  ;;  %v563_v16 = vmul.f32 %v560_v13, %v551_v12 }
 0x2eb   : > { %v663_v6 = vld [vmem:[#allocation4] sm:$0xff] }
 0x2ec   : > { %1058 = vrcp.f32 %v663_v6 }
 0x2ef   : > { %v664_v7 = vld [vmem:[#allocation4 + $0x8] sm:$0xff] }
 0x2f0   : > { %1060 = vrcp.f32 %v664_v7 }
 0x2f6   : > { %v1059_v8 = vpop.eup %1058 }
 0x2f7   : > { %671 = vperm.xlu0 %1033, %v1059_v8  }
 0x2fa   : > { %v1061_v9 = vpop.eup %1060 }
 0x2fb   : > { %676 = vperm.xlu0 %1033, %v1061_v9  }
 0x32d   : > { %v647_v15 = vpop.f32.mrb[0].mxu1 }
 0x32e   : > { %v654_v17 = vadd.f32 %v647_v15, %v562_v14  ;;  %v953_v18 = vpop.f32.mrb[1].mxu1 }
 0x32f   : > { %v650_v19 = vpop.f32.mrb[2].mxu1 }
 0x330   : > { %656 = vst.msk [vmem:[#allocation5] sm:$0xff] %vm346_vm0, %v654_v17  ;;  %v655_v20 = vadd.f32 %v650_v19, %v563_v16  ;;  %v954_v21 = vpop.f32.mrb[3].mxu1 }
 0x332   : > { %657 = vst.msk [vmem:[#allocation5 + $0x8] sm:$0xff] %vm346_vm0, %v655_v20 }
 0x337   : > { %v667_v22 = vld [vmem:[#allocation5] sm:$0xff] }
 0x339   : > { %v668_v26 = vld [vmem:[#allocation5 + $0x8] sm:$0xff] }
 0x376   : > { %v672_v23 = vpop.permute.xlu0 %671 }
 0x377   : > { %v679_v24 = vmul.f32 %v672_v23, %v667_v22 }
 0x379   : > { %v895_v25 = vpack.c.bf16 %v679_v24, %v679_v24 }
 0x37a   : > { %v677_v27 = vpop.permute.xlu0 %676 }
 0x37b   : > { %690 = vst.msk [vmem:[%s286_s24] sm:$0xf] %vm689_vm4, %v895_v25  ;;  %v680_v28 = vmul.f32 %v677_v27, %v668_v26 }
 0x37d   : > { %v896_v29 = vpack.c.bf16 %v680_v28, %v680_v28 }
 0x37f   : > { %691 = vst.msk [vmem:[%s286_s24 + $0x4] sm:$0xf] %vm689_vm4, %v896_v29 }
 0x380   : > { %1075 = shalt.err (!%p1072_p7)
}
 0x381   : > { %s1076_s9 = scalar_lea.hbm %s1348_s29, 128  ;;  %s1080_s20 = scalar_lea.hbm %s1405_s3, 1024 }
 0x382   : > { %p1077_p9 = scmp.ne.s32.totalorder %s1348_s29, %s1076_s9  ;;  %p1081_p12 = scmp.lt.u32.totalorder %s1348_s29, %s1405_s3 }
 0x383   : > { %p1082_p13 = scmp.lt.u32.totalorder %s1080_s20, %s1076_s9  ;;  %p1084_p1 = scmp.lt.u32.totalorder %s1076_s9, %s1348_s29 }
 0x384   : > { %p1078_p10 = pnand %p1077_p9, %p1236_p3 }
 0x385   : > { %p1083_p0 = por %p1082_p13, %p1081_p12 }
 0x386   : > { %p1079_p11 = pneg %p1078_p10 }
 0x387   : > { %p1085_p2 = por %p1084_p1, %p1083_p0 }
 0x389   : > { %p1086_p4 = pnand %p1085_p2, %p1079_p11 }
 0x38b   : > { %1089 = shalt.err (!%p1086_p4)
}
 0x38c   : > { %s1163_s28 = smov 64   ;;  %s1164_s15 = smov 4  }
 0x38d   : > { %955 = dma.vmem_to_hbm [thread:$0]  (%p1236_p3), %s1343_s27, 128, %s1348_s29, %s1350_s4, %s1163_s28, %s1163_s28, %s1164_s15  }
 0x38e PF: > { %p961_p5 = scmp.ge.s32.totalorder %s1156_s19, 2  ;;  %s725_s16 = sand.u32 1, %s1128_s12  }
 0x38f   : > { %s726_s5 = scalar_lea.sflag [#allocation7], %s725_s16 }
 0x390   : > { %p958_p6 = pnand %p961_p5, %p1245_p8 }
 0x392   : > { %1123 = dma.done.wait (!%p958_p6), %s726_s5, 128  }
 0x393   : > { %1125 = vsyncadd (!%p958_p6), %s726_s5, 4294967168  ;;  %s16_s19 = sadd.s32 1, %s1156_s19   ;;  %s1408_s12 = smov %s1132_s13 }
 0x394   : > { %p13_p7 = scmp.ge.s32.totalorder %s16_s19, 10   ;;  %s1409_s13 = smov %s1136_s14 }
 0x395   : > { %s1410_s14 = smov %s1254_s30  ;;  %s1411_s15 = smov %s1148_s17 }
 0x396   : > { %s1412_s16 = smov %s1152_s18  ;;  %s1413_s17 = smov %s1416_s22 }
 0x397   : > { %s1414_s18 = smov %s1420_s23  ;;  %15 = sbr.rel (!%p13_p7) target bundleno = 5 (0x5), region = 81 }
 0x39e   :  { %731 = vsyncpa [#allocation7], 1 }
 0x39f   :  { %733 = vsyncpa [#allocation7 + $0x1], 1 }

</bundles_post_ra>
